<compile_context>
chip_gen: v6e
topology: v6e:2x2x1
jax: 0.10.0
libtpu: 0.0.40
codegen_flags: <defaults>
</compile_context>

<pallas_src>
import jax
import jax.numpy as jnp
from jax.experimental import pallas as pl
from jax.experimental.pallas import tpu as pltpu


# Per-buffer byte target for the streamed `repr` tile. HBM roofline saturates
# around 2-8 MiB tiles; 8 MiB/buffer (16 MiB double-buffered) stays well inside
# v7x's 64 MiB VMEM together with the scoped limit below.
_TILE_TARGET_BYTES = 8 * 1024 * 1024
_DEFAULT_VMEM_LIMIT_BYTES = 32 * 1024 * 1024


def _round_up(x, m):
    return ((x + m - 1) // m) * m


def _ceil_div(a, b):
    return -(-a // b)


def _sublane_multiple(dtype):
    # Sub-32-bit dtypes pack along sublanes: 8 rows for 4-byte, 16 for 2-byte,
    # 32 for 1-byte dtypes keep blocks full-width / unmasked.
    return max(8, 32 // jnp.dtype(dtype).itemsize)


def _vmem_limit_bytes():
    limit = _DEFAULT_VMEM_LIMIT_BYTES
    try:
        cap = pltpu.get_tpu_info().vmem_capacity_bytes
        limit = min(limit, max(16 * 1024 * 1024, cap // 2))
    except Exception:
        pass  # fall back to the conservative default
    return limit


def _make_kernel(*, tile_n, n_valid, radius_sq, soft_boundary, needs_mask):
    """Per-tile partial sums: hinge (soft-boundary) or squared distance."""

    def kernel(repr_ref, center_ref, out_ref):
        x = repr_ref[...].astype(jnp.float32)                  # (tile_n, D)
        c = center_ref[...].astype(jnp.float32)                # (1, D)
        diff = x - c
        sq = diff * diff

        if soft_boundary or needs_mask:
            # Per-example squared distance to the center (lane reduction).
            dsq = jnp.sum(sq, axis=1, keepdims=True)           # (tile_n, 1)
            if needs_mask:
                # Discard garbage out-of-bounds rows of the last block with a
                # select (drops NaN/Inf from OOB reads before any output sum).
                row = jax.lax.broadcasted_iota(jnp.int32, dsq.shape, 0)
                gidx = pl.program_id(0) * tile_n + row
                dsq = jnp.where(gidx < n_valid, dsq, jnp.float32(0.0))
            if soft_boundary:
                # Masked rows have dsq == 0 -> hinge == max(-R^2, 0) == 0.
                val = jnp.maximum(dsq - jnp.float32(radius_sq), jnp.float32(0.0))
            else:
                val = dsq
            partial = jnp.sum(val)                             # scalar per tile
        else:
            # minimal-distance, full tile: skip the per-row reduce stage.
            partial = jnp.sum(sq)

        out_ref[...] = jnp.full(out_ref.shape, partial, jnp.float32)

    return kernel


def semi_svsd_one_class_loss(repr_, center, *, gamma=0.5, radius=1.0,
                             repr_loss="soft-boundary", tile_n=None):
    """One-class SemiSVSD loss.

    Returns (lossToOptim, sumOfDistLoss, nExamps) matching the PyTorch forward.
    """
    if repr_loss not in ("soft-boundary", "minimal-distance"):
        raise ValueError("repr_loss must be 'soft-boundary' or 'minimal-distance'")
    if gamma <= 0 or gamma > 1:
        raise ValueError("gamma must be in (0, 1]")

    repr_ = jnp.asarray(repr_)      # keep native dtype (bf16 stays bf16 in HBM)
    n, d = repr_.shape
    itemsize = jnp.dtype(repr_.dtype).itemsize
    sub = _sublane_multiple(repr_.dtype)

    # --- tile selection: byte-budgeted rows, sublane-aligned, >= 2 tiles ----
    if tile_n is None:
        tile_n = _TILE_TARGET_BYTES // max(1, d * itemsize)
        # Guarantee >= 2 tiles when the batch is big enough so both v7x
        # TensorCores stream (harmless extra step on single-TC chips).
        tile_n = min(tile_n, _round_up(_ceil_div(n, 2), sub))
    tile_n = max(sub, (int(tile_n) // sub) * sub)   # dtype sublane multiple
    tile_n = min(tile_n, _round_up(n, sub))         # don't exceed the batch

    num_tiles = _ceil_div(n, tile_n)
    needs_mask = (n % tile_n) != 0                  # last block partially OOB

    center_row = jnp.asarray(center, jnp.float32).reshape(1, d)
    soft_boundary = repr_loss == "soft-boundary"
    radius_sq = float(radius) ** 2 if radius is not None else 0.0
    gamma_inv = 1.0 / float(gamma)

    kernel = _make_kernel(tile_n=tile_n, n_valid=n, radius_sq=radius_sq,
                          soft_boundary=soft_boundary, needs_mask=needs_mask)

    partials = pl.pallas_call(
        kernel,
        out_shape=jax.ShapeDtypeStruct((num_tiles, 8, 128), jnp.float32),
        grid_spec=pltpu.PrefetchScalarGridSpec(
            num_scalar_prefetch=0,
            grid=(num_tiles,),
            in_specs=[
                pl.BlockSpec((tile_n, d), lambda i: (i, 0)),   # repr tile
                pl.BlockSpec((1, d), lambda i: (0, 0)),        # center (broadcast)
            ],
            out_specs=pl.BlockSpec((1, 8, 128), lambda i: (i, 0, 0)),
        ),
        compiler_params=pltpu.CompilerParams(
            dimension_semantics=("parallel",),                 # independent tiles
            vmem_limit_bytes=_vmem_limit_bytes(),
        ),
    )(repr_, center_row)

    total = jnp.sum(partials[:, 0, 0])
    if soft_boundary:
        sum_of_dist_loss = total                               # hinge sum
        loss_to_optim = (total / n) * gamma_inv + radius_sq
    else:
        sum_of_dist_loss = total                               # dist-square sum
        loss_to_optim = total / n

    return loss_to_optim, sum_of_dist_loss, n


# TODO(synk): multi-class branch calls an external `weightedBCELoss` that is not
# defined in the provided source; only the one-class representation loss is
# implemented here.


def _reference(repr_, center, gamma, radius, repr_loss):
    """Plain-JAX reference mirroring the PyTorch forward (one-class)."""
    dist_sq = jnp.sum((repr_ - center[None, :]) ** 2, axis=1)
    r2 = radius ** 2
    if repr_loss == "minimal-distance":
        return jnp.mean(dist_sq), jnp.sum(dist_sq)
    hinge = jnp.maximum(dist_sq - r2, 0.0)
    return jnp.mean(hinge) * (1.0 / gamma) + r2, jnp.sum(hinge)


if __name__ == "__main__":
    # Small shapes: batch=16 examples, hidden=32 representation dims.
    N, D = 16, 32
    gamma, radius = 0.5, 1.0

    key = jax.random.PRNGKey(0)
    k_repr, k_center = jax.random.split(key)
    repr_ = jax.random.normal(k_repr, (N, D), dtype=jnp.float32)
    center = jax.random.normal(k_center, (D,), dtype=jnp.float32) * 0.1

    ok = True

    # 1) Both loss modes, f32 input, auto tile selection.
    for mode in ("soft-boundary", "minimal-distance"):
        loss, dist_loss_sum, n_examples = semi_svsd_one_class_loss(
            repr_, center, gamma=gamma, radius=radius, repr_loss=mode)
        loss = jax.block_until_ready(loss)
        dist_loss_sum = jax.block_until_ready(dist_loss_sum)
        ref_loss, ref_sum = _reference(repr_, center, gamma, radius, mode)
        ok &= bool(jnp.allclose(loss, ref_loss, rtol=1e-5, atol=1e-5))
        ok &= bool(jnp.allclose(dist_loss_sum, ref_sum, rtol=1e-5, atol=1e-5))
        ok &= (n_examples == N)

    # 2) Ragged batch, explicit tile_n (no pad: OOB last block + row mask).
    N2 = 20
    repr2 = jax.random.normal(jax.random.PRNGKey(1), (N2, D), dtype=jnp.float32)
    loss2, sum2, n2 = semi_svsd_one_class_loss(
        repr2, center, gamma=gamma, radius=radius,
        repr_loss="soft-boundary", tile_n=8)
    loss2 = jax.block_until_ready(loss2)
    ref_loss2, ref_sum2 = _reference(repr2, center, gamma, radius, "soft-boundary")
    ok &= bool(jnp.allclose(loss2, ref_loss2, rtol=1e-5, atol=1e-5))
    ok &= bool(jnp.allclose(sum2, ref_sum2, rtol=1e-5, atol=1e-5))
    ok &= (n2 == N2)

    # 3) Ragged batch, auto tile, minimal-distance (masked dsq path, no hinge).
    loss3, sum3, _ = semi_svsd_one_class_loss(
        repr2, center, gamma=gamma, radius=radius, repr_loss="minimal-distance")
    loss3 = jax.block_until_ready(loss3)
    ref_loss3, ref_sum3 = _reference(repr2, center, gamma, radius, "minimal-distance")
    ok &= bool(jnp.allclose(loss3, ref_loss3, rtol=1e-5, atol=1e-5))
    ok &= bool(jnp.allclose(sum3, ref_sum3, rtol=1e-5, atol=1e-5))

    # 4) Native bf16 input streamed directly (16-row sublane multiple path).
    repr_bf16 = repr_.astype(jnp.bfloat16)
    loss4, sum4, _ = semi_svsd_one_class_loss(
        repr_bf16, center, gamma=gamma, radius=radius, repr_loss="soft-boundary")
    loss4 = jax.block_until_ready(loss4)
    ref_loss4, ref_sum4 = _reference(repr_bf16.astype(jnp.float32), center,
                                     gamma, radius, "soft-boundary")
    ok &= bool(jnp.allclose(loss4, ref_loss4, rtol=1e-5, atol=1e-5))
    ok &= bool(jnp.allclose(sum4, ref_sum4, rtol=1e-5, atol=1e-5))

    if ok:
        print("KERNEL_OK")
    else:
        print("KERNEL_MISMATCH")
</pallas_src>

<mosaic_0001>
module attributes {stable_mosaic.version = 11 : i64} {
  func.func @kernel(%arg0: i32, %arg1: memref<8x32xf32, #tpu.memory_space<vmem>>, %arg2: memref<1x32xf32, #tpu.memory_space<vmem>>, %arg3: memref<1x8x128xf32, #tpu.memory_space<vmem>>) attributes {dimension_semantics = [#tpu.dimension_semantics<parallel>], iteration_bounds = array<i64: 2>, scalar_prefetch = 0 : i64, scratch_operands = 0 : i64, tpu.core_type = #tpu.core_type<tc>, window_params = [{transform_indices = @transform_0, window_bounds = array<i64: 8, 32>}, {pipeline_mode = #tpu.pipeline_mode<synchronous>, transform_indices = @transform_1, window_bounds = array<i64: 1, 32>}, {transform_indices = @transform_2, window_bounds = array<i64: 1, 8, 128>}]} {
    %c0 = arith.constant 0 : index
    %c0_0 = arith.constant 0 : index
    %0 = vector.load %arg1[%c0, %c0_0] : memref<8x32xf32, #tpu.memory_space<vmem>>, vector<8x32xf32>
    %c0_1 = arith.constant 0 : index
    %c0_2 = arith.constant 0 : index
    %1 = vector.load %arg2[%c0_1, %c0_2] : memref<1x32xf32, #tpu.memory_space<vmem>>, vector<1x32xf32>
    %2 = vector.broadcast %1 : vector<1x32xf32> to vector<8x32xf32>
    %3 = arith.subf %0, %2 : vector<8x32xf32>
    %4 = arith.mulf %3, %3 : vector<8x32xf32>
    %cst = arith.constant dense<0.000000e+00> : vector<8xf32>
    %5 = vector.multi_reduction <add>, %4, %cst [1] : vector<8x32xf32> to vector<8xf32>
    %6 = vector.shape_cast %5 : vector<8xf32> to vector<8x1xf32>
    %cst_3 = arith.constant 1.000000e+00 : f32
    %7 = vector.broadcast %cst_3 : f32 to vector<8x1xf32>
    %8 = arith.subf %6, %7 : vector<8x1xf32>
    %cst_4 = arith.constant 0.000000e+00 : f32
    %9 = vector.broadcast %cst_4 : f32 to vector<8x1xf32>
    %10 = arith.maximumf %8, %9 : vector<8x1xf32>
    %11 = vector.shape_cast %10 : vector<8x1xf32> to vector<1x8x1xf32>
    %cst_5 = arith.constant dense<0.000000e+00> : vector<1xf32>
    %12 = vector.multi_reduction <add>, %11, %cst_5 [1, 2] : vector<1x8x1xf32> to vector<1xf32>
    %13 = vector.shape_cast %12 : vector<1xf32> to vector<1x1x1xf32>
    %14 = vector.extract %13[0, 0, 0] : f32 from vector<1x1x1xf32>
    %15 = vector.broadcast %14 : f32 to vector<1x8x128xf32>
    %c0_6 = arith.constant 0 : index
    %c0_7 = arith.constant 0 : index
    %c0_8 = arith.constant 0 : index
    %16 = vector.load %arg3[%c0_6, %c0_7, %c0_8] : memref<1x8x128xf32, #tpu.memory_space<vmem>>, vector<1x8x128xf32>
    tpu.vector_store %arg3[%c0_6, %c0_7, %c0_8], %15 {strides = array<i32>} : memref<1x8x128xf32, #tpu.memory_space<vmem>>, vector<1x8x128xf32>,
    return
  }
  func.func @transform_0(%arg0: i32) -> (i32, i32) {
    %c0_i32 = arith.constant 0 : i32
    %c0_i32_0 = arith.constant 0 : i32
    return %arg0, %c0_i32 : i32, i32
  }
  func.func @transform_1(%arg0: i32) -> (i32, i32) {
    %c0_i32 = arith.constant 0 : i32
    %c0_i32_0 = arith.constant 0 : i32
    %c0_i32_1 = arith.constant 0 : i32
    return %c0_i32, %c0_i32_0 : i32, i32
  }
  func.func @transform_2(%arg0: i32) -> (i32, i32, i32) {
    %c0_i32 = arith.constant 0 : i32
    %c0_i32_0 = arith.constant 0 : i32
    %c0_i32_1 = arith.constant 0 : i32
    return %arg0, %c0_i32, %c0_i32_0 : i32, i32, i32
  }
}

</mosaic_0001>

<bundles_post_ra>
// kernel: tpu_custom_call.1
= control target key start
LH: loop header
LB: loop body
LE: loop exit
PB: predicated region body
PF: predicated region fallthrough
CT: control target
= control target key end

     0   :  { %7 = vsyncpa [#allocation3], 0  ;;  %s595_s0 = inlined_call_operand.hbm [shape: f32[16,32], index: 0, kind: input, shape index: {}]   ;;  %s596_s1 = inlined_call_operand.vmem [shape: f32[1,32], index: 1, kind: input, shape index: {}]   ;;  %s597_s2 = inlined_call_operand.hbm [shape: f32[2,8,128], index: 2, kind: output, shape index: {}]  }
   0x1   :  { %9 = vsyncpa [#allocation3 + $0x1], 0 }
   0x2   :  { %10 = vsyncpa [#allocation4], 0 }
   0x3   :  { %12 = vsyncpa [#allocation4 + $0x1], 0  ;;  %s445_s9 = smov 0   ;;  %s447_s10 = smov 0  }
   0x4   :  { %s449_s11 = smov 0   ;;  %s451_s12 = smov 0  }
   0x5 LB: > { %s466_s13 = sadd.s32 4294967295, %s426_s12   ;;  %s272_s14 = sadd.s32 4294967294, %s426_s12   ;;  %s426_s12 = sphi %s451_s12, %s614_s12   ;;  %s422_s11 = sphi %s449_s11, %s613_s11   ;;  %s418_s10 = sphi %s447_s10, %s612_s10   ;;  %s414_s9 = sphi %s445_s9, %s611_s9  }
   0x6   : > { %s470_s15 = sadd.s32 1, %s426_s12   ;;  %s25_s16 = sadd.s32 1, %s422_s11 }
   0x7   : > { %s22_s17 = ssub.s32 %s426_s12, %s470_s15  ;;  %p32_p0 = scmp.ne.s32.totalorder %s422_s11, %s418_s10 }
   0x8   : > { %p23_p1 = scmp.eq.s32.totalorder %s22_s17, 0  ;;  %p33_p2 = scmp.eq.s32.totalorder %s426_s12, 0 }
   0x9   : > { %p38_p3 = scmp.ne.s32.totalorder %s418_s10, %s414_s9  ;;  %p39_p4 = scmp.eq.s32.totalorder %s466_s13, 0 }
   0xa   : > { %s482_s18 = scalar_select %p23_p1, %s422_s11, %s25_s16  }
   0xb   : > { %p484_p5 = por %p33_p2, %p32_p0  ;;  %p488_p6 = por %p39_p4, %p38_p3 }
   0xc   : > { %p83_p7 = scmp.eq.s32.totalorder %s466_s13, 1  ;;  %p89_p8 = scmp.eq.s32.totalorder %s272_s14, 1 }
   0xd   : > { %s601_s20 = scalar_select %p488_p6, 1, 0 }
   0xe   : > { %p300_p10 = scmp.lt.s32.totalorder %s426_s12, 2  ;;  %p495_p11 = por %p83_p7, %p32_p0 }
   0xf   : > { %p499_p12 = por %p89_p8, %p38_p3  ;;  %s112_s23 = sand.u32 1, %s422_s11  }
  0x10   : > { %s602_s21 = scalar_select %p495_p11, 1, 0 }
  0x11   : > { %s603_s22 = scalar_select %p499_p12, 1, 0 }
  0x12   : > { %s276_s24 = sshll.u32 %s426_s12, 7  ;;  %s275_s25 = sshll.u32 %s112_s23, 3 }
  0x13   : > { %s508_s28 = scalar_lea.hbm %s595_s0, %s276_s24  ;;  %s116_s29 = scalar_lea.vmem [#allocation2], %s275_s25 }
  0x14   : > { %s123_s30 = sshll.u32 %s116_s29, 4  ;;  %p512_p13 = pnand %p300_p10, %p484_p5  ;;  %s516_s30 = int_to_ptr.vmem [resolvable:$true] %s123_s30 }
  0x15   : > { %s113_s4 = scalar_lea.sflag [#allocation3], %s112_s23  ;;  %s334_s5 = scalar_lea.hbm %s508_s28, 128 }
  0x16   : > { %p335_p2 = scmp.ne.s32.totalorder %s508_s28, %s334_s5  ;;  %p336_p3 = pneg %p512_p13 }
  0x17   : > { %s339_s8 = scalar_lea.hbm %s595_s0, 256  ;;  %p340_p5 = scmp.lt.s32.totalorder %s508_s28, %s595_s0 }
  0x18   : > { %p337_p4 = pnand %p336_p3, %p335_p2  ;;  %p341_p8 = scmp.lt.s32.totalorder %s339_s8, %s334_s5 }
  0x1a   : > { %p338_p7 = pneg %p337_p4  ;;  %p342_p10 = por %p341_p8, %p340_p5 }
  0x1c   : > { %p343_p9 = pnand %p342_p10, %p338_p7 }
  0x1e   : > { %346 = shalt.err (!%p343_p9)
}
  0x1f   : > { %s347_s17 = scalar_lea.vmem %s516_s30, 128  ;;  %s428_s19 = smov [#allocation2]  }
  0x20   : > { %p348_p0 = scmp.ne.s32.totalorder %s516_s30, %s347_s17  ;;  %s352_s23 = sshll.u32 %s428_s19, 4  ;;  %s353_s23 = int_to_ptr.vmem [resolvable:$false] %s352_s23 }
  0x21   : > { %s354_s24 = scalar_lea.vmem %s353_s23, 256  ;;  %p355_p4 = scmp.lt.s32.totalorder %s516_s30, %s353_s23 }
  0x22   : > { %p350_p1 = pnand %p348_p0, %p336_p3  ;;  %p356_p12 = scmp.lt.s32.totalorder %s354_s24, %s347_s17 }
  0x24   : > { %p351_p2 = pneg %p350_p1  ;;  %p357_p11 = por %p356_p12, %p355_p4 }
  0x26   : > { %p358_p6 = pnand %p357_p11, %p351_p2 }
  0x28   : > { %361 = shalt.err (!%p358_p6)
}
  0x29   : > { %295 = dma.hbm_to_vmem [thread:$0]  (!%p512_p13), %s508_s28, 128, %s516_s30, %s113_s4  }
  0x2a   : > { %p605_p9 = scmp.lt.s32.totalorder %s426_s12, 3  ;;  %p606_p7 = scmp.ge.s32.totalorder %s426_s12, 1 }
  0x2c   : > { %p129_p0 = pnand %p606_p7, %p605_p9 }
  0x2d   : > { %s543_s25 = sand.u32 (!%p129_p0), 1, %s418_s10   ;;  %p607_p6 = scmp.ne.s32.totalorder (!%p129_p0), %s601_s20, 0 }
  0x2e   : > { %132 = sbr.rel (%p129_p0) target bundleno = 416 (0x1a0), region = 28  ;;  %s278_s26 = sshll.u32 (!%p129_p0), %s543_s25, 3 }
  0x2f   : > { %s135_s27 = scalar_lea.sflag (!%p129_p0), [#allocation3], %s543_s25  ;;  %s138_s29 = scalar_lea.vmem (!%p129_p0), [#allocation2], %s278_s26 }
  0x33   : > { %405 = dma.done.wait (%p607_p6), %s135_s27, 128  }
  0x34   : > { %407 = vsyncadd (%p607_p6), %s135_s27, 4294967168  ;;  %v159_v0 = vld [vmem:[%s138_s29] sm:$0xff]  ;;  %vm169_vm0 = vcmask 261120   ;;  %vm175_vm1 = vcmask 7168   ;;  %s158_s20 = scalar_lea.vmem [#allocation5], %s278_s26  ;;  %s283_s4 = sshll.u32 %s466_s13, 7 }
  0x35   : > { %v280_v1 = vld [vmem:[%s596_s1] ss:$0 sm:$0xff]  ;;  %s202_s3 = sshll.u32 %s158_s20, 4  ;;  %s200_s8 = scalar_lea.hbm %s597_s2, %s283_s4  ;;  %s555_s3 = int_to_ptr.vmem [resolvable:$true] %s202_s3 }
  0x36   : > { %v167_v2 = vsub.f32 %v159_v0, %v280_v1  ;;  %s189_s14 = scalar_lea.sflag [#allocation4], %s543_s25  ;;  %s362_s16 = scalar_lea.vmem %s555_s3, 128 }
  0x37   : > { %p363_p11 = scmp.ne.s32.totalorder %s555_s3, %s362_s16  ;;  %p608_p12 = scmp.ne.s32.totalorder %s602_s21, 0 }
  0x38   : > { %v168_v3 = vmul.f32 %v167_v2, %v167_v2  ;;  %s429_s17 = smov [#allocation5]  }
  0x39   : > { %p364_p13 = pnand %p363_p11, %p608_p12  ;;  %s366_s13 = sshll.u32 %s429_s17, 4  ;;  %s367_s13 = int_to_ptr.vmem [resolvable:$false] %s366_s13 }
  0x3a   : > { %v170_v4 = vsel %vm169_vm0, %v168_v3, 0.0  ;;  %s368_s19 = scalar_lea.vmem %s367_s13, 256  ;;  %p369_p3 = scmp.lt.s32.totalorder %s555_s3, %s367_s13 }
  0x3b   : > { %171 = vadd.xlane.f32.xlu0 %v170_v4  ;;  %p365_p1 = pneg %p364_p13  ;;  %p370_p5 = scmp.lt.s32.totalorder %s368_s19, %s362_s16 }
  0x3d   : > { %p371_p8 = por %p370_p5, %p369_p3 }
  0x3f   : > { %p372_p10 = pnand %p371_p8, %p365_p1 }
  0xc4   : > { %v172_v5 = vpop.xlane.xlu0 %171 }
  0xc5   : > { %v281_v6 = vadd.f32 -1.0, %v172_v5 }
  0xc7   : > { %v174_v7 = vmax.f32 %v281_v6, 0.0 }
  0xc9   : > { %v176_v8 = vsel %vm175_vm1, %v174_v7, 0.0 }
  0xca   : > { %177 = vadd.xlane.f32.xlu0 %v176_v8 }
 0x153   : > { %v178_v9 = vpop.xlane.xlu0 %177 }
 0x154   : > { %v179_v10 = vrot.slane %v178_v9, 4 }
 0x156   : > { %v180_v11 = vadd.f32 %v179_v10, %v178_v9 }
 0x158   : > { %v181_v12 = vrot.slane %v180_v11, 2 }
 0x15a   : > { %v182_v13 = vadd.f32 %v181_v12, %v180_v11 }
 0x15c   : > { %v183_v14 = vrot.slane %v182_v13, 1 }
 0x15e   : > { %v184_v15 = vadd.f32 %v183_v14, %v182_v13 }
 0x160   : > { %286 = vpush %v184_v15 }
 0x191   : > { %s287_s5 = spop %286 }
 0x192   : > { %v186_v16 = vstv %s287_s5 }
 0x193   : > { %187 = vst [vmem:[%s158_s20] sm:$0xff] %v186_v16 }
 0x194   : > { %375 = shalt.err (!%p372_p10)
}
 0x195   : > { %s376_s23 = scalar_lea.hbm %s200_s8, 128  ;;  %s380_s26 = scalar_lea.hbm %s597_s2, 256 }
 0x196   : > { %p377_p2 = scmp.ne.s32.totalorder %s200_s8, %s376_s23  ;;  %p381_p7 = scmp.lt.s32.totalorder %s200_s8, %s597_s2 }
 0x197   : > { %p382_p0 = scmp.lt.s32.totalorder %s380_s26, %s376_s23 }
 0x198   : > { %p378_p4 = pnand %p377_p2, %p608_p12 }
 0x199   : > { %p383_p6 = por %p382_p0, %p381_p7 }
 0x19a   : > { %p379_p9 = pneg %p378_p4 }
 0x19c   : > { %p384_p11 = pnand %p383_p6, %p379_p9 }
 0x19e   : > { %387 = shalt.err (!%p384_p11)
}
 0x19f   : > { %290 = dma.vmem_to_hbm [thread:$0]  (%p608_p12), %s555_s3, 128, %s200_s8, %s189_s14  }
 0x1a0 PF: > { %s214_s28 = sand.u32 1, %s414_s9   ;;  %p609_p13 = scmp.ne.s32.totalorder %s603_s22, 0 }
 0x1a1   : > { %p610_p1 = scmp.ge.s32.totalorder %s426_s12, 2  ;;  %s215_s30 = scalar_lea.sflag [#allocation4], %s214_s28 }
 0x1a3   : > { %p297_p3 = pnand %p610_p1, %p609_p13 }
 0x1a5   : > { %p298_p5 = pneg %p297_p3 }
 0x1a7   : > { %409 = dma.done.wait (%p298_p5), %s215_s30, 128  }
 0x1a8   : > { %411 = vsyncadd (%p298_p5), %s215_s30, 4294967168  ;;  %p15_p8 = scmp.ge.s32.totalorder %s470_s15, 4   ;;  %s611_s9 = smov %s418_s10 }
 0x1a9   : > { %s612_s10 = smov %s422_s11  ;;  %s613_s11 = smov %s482_s18 }
 0x1aa   : > { %s614_s12 = smov %s470_s15  ;;  %17 = sbr.rel (!%p15_p8) target bundleno = 5 (0x5), region = 73 }
 0x1af   :  { %220 = vsyncpa [#allocation3], 1 }
 0x1b0   :  { %222 = vsyncpa [#allocation3 + $0x1], 1 }
 0x1b1   :  { %223 = vsyncpa [#allocation4], 1 }
 0x1b2   :  { %225 = vsyncpa [#allocation4 + $0x1], 1 }

</bundles_post_ra>
